<compile_context>
chip_gen: v5e
topology: v5e:2x2
jax: 0.10.0
libtpu: 0.0.40
codegen_flags: <defaults>
</compile_context>

<pallas_src>
import jax
import jax.numpy as jnp
from jax.experimental import pallas as pl
from jax.experimental.pallas import tpu as pltpu


def _round_up(n, m):
    return ((n + m - 1) // m) * m


def _pack_factor(d):
    """Return (P, Dp): P logical rows of padded width Dp packed per 128-lane row."""
    dp = max(8, pl.next_power_of_2(d))
    if dp >= 128:
        return 1, _round_up(d, 128)
    return 128 // dp, dp


_MAX_ROWS_PER_TILE = 4096  # logical batch rows per grid step (review item 4)


def _pick_tile_pb(pb, pack):
    """Packed-rows-per-tile: multiple of 8, minimal tail padding, >=2 grid steps."""
    max_tile = max(8, _MAX_ROWS_PER_TILE // pack)
    if pb <= 8:
        return 8
    n_tiles = max(2, pl.cdiv(pb, max_tile))          # >=2 steps for v7x megacore
    return min(_round_up(pl.cdiv(pb, n_tiles), 8), _round_up(pb, 8))


def _mlp_kernel(x_ref, w1_ref, b1_ref, w2_ref, b2_ref, w3_ref, b3_ref, o_ref):
    # x_ref: (tile_pb, 128) f32 streamed; weights bf16 resident; biases f32; b3 SMEM.
    xb = x_ref[...].astype(jnp.bfloat16)              # in-kernel cast (review item 1)

    # fc1 + ReLU (MXU, bf16 inputs, f32 accumulation); block-diag W1 => per-row fc1.
    h1 = jnp.dot(xb, w1_ref[...], preferred_element_type=jnp.float32)
    h1 = jnp.maximum(h1 + b1_ref[...], 0.0)

    # fc2 + ReLU (MXU).
    h2 = jnp.dot(h1.astype(jnp.bfloat16), w2_ref[...],
                 preferred_element_type=jnp.float32)
    h2 = jnp.maximum(h2 + b2_ref[...], 0.0)

    # fc3 as a block-diag matmul: P outputs per packed row (no XLU reduce,
    # no width-1 column store).
    out = jnp.dot(h2.astype(jnp.bfloat16), w3_ref[...],
                  preferred_element_type=jnp.float32)
    o_ref[...] = (out + b3_ref[0, 0]).astype(o_ref.dtype)


def _pack_params(params, d, pack, dp, hp):
    """Build padded, block-diagonal weights (tiny one-time prep; hoist in prod)."""
    h = params["w1"].shape[1]
    eye = jnp.eye(pack, dtype=jnp.float32)
    w1 = jnp.pad(params["w1"], ((0, dp - d), (0, hp - h)))
    w2 = jnp.pad(params["w2"], ((0, hp - h), (0, hp - h)))
    w3 = jnp.pad(params["w3"], ((0, hp - h), (0, 0)))
    b1 = jnp.pad(params["b1"], ((0, 0), (0, hp - h)))
    b2 = jnp.pad(params["b2"], ((0, 0), (0, hp - h)))
    w1_bd = jnp.kron(eye, w1).astype(jnp.bfloat16)          # (P*Dp, P*Hp)
    w2_bd = jnp.kron(eye, w2).astype(jnp.bfloat16)          # (P*Hp, P*Hp)
    w3_bd = jnp.kron(eye, w3).astype(jnp.bfloat16)          # (P*Hp, P)
    b1_t = jnp.tile(b1, (1, pack)).astype(jnp.float32)      # (1, P*Hp)
    b2_t = jnp.tile(b2, (1, pack)).astype(jnp.float32)      # (1, P*Hp)
    b3 = jnp.reshape(params["b3"], (1, 1)).astype(jnp.float32)
    return w1_bd, b1_t, w2_bd, b2_t, w3_bd, b3


def continuous_q_forward(x, params):
    """ContinuousQ forward: x (B, input_dim) f32 -> (B, 1) f32."""
    B, D = x.shape
    H = params["w1"].shape[1]

    pack, dp = _pack_factor(D)                 # e.g. D=32 -> pack=4, dp=32
    hp = _round_up(H, 128 // pack)             # per-row padded hidden width
    DL = pack * dp                             # packed x row width (128 when pack>1)
    HL = pack * hp                             # packed hidden width (mult of 128)

    w1_bd, b1_t, w2_bd, b2_t, w3_bd, b3 = _pack_params(params, D, pack, dp, hp)

    # Batch tiling over packed rows (review items 4 & 5).
    pb = pl.cdiv(B, pack)
    tile_pb = _pick_tile_pb(pb, pack)
    pb_pad = _round_up(pb, tile_pb)
    b_pad = pb_pad * pack

    # Pack x.  In the common case (D == dp, B == b_pad) this is a free,
    # metadata-only reshape -- x is NOT copied or cast in the wrapper.
    if b_pad != B or dp != D:
        x = jnp.pad(x, ((0, b_pad - B), (0, dp - D)))
    x_packed = jnp.reshape(x, (pb_pad, DL))

    grid = (pb_pad // tile_pb,)
    const = lambda i: (0, 0)

    out = pl.pallas_call(
        _mlp_kernel,
        out_shape=jax.ShapeDtypeStruct((pb_pad, pack), jnp.float32),
        grid=grid,
        in_specs=[
            pl.BlockSpec((tile_pb, DL), lambda i: (i, 0)),   # x: f32, streamed
            pl.BlockSpec((DL, HL), const),                   # w1_bd: resident
            pl.BlockSpec((1, HL), const),                    # b1
            pl.BlockSpec((HL, HL), const),                   # w2_bd: resident
            pl.BlockSpec((1, HL), const),                    # b2
            pl.BlockSpec((HL, pack), const),                 # w3_bd: resident
            pl.BlockSpec((1, 1), const,
                         memory_space=pltpu.MemorySpace.SMEM),  # b3 scalar
        ],
        out_specs=pl.BlockSpec((tile_pb, pack), lambda i: (i, 0)),
        compiler_params=pltpu.CompilerParams(
            dimension_semantics=("parallel",),
            vmem_limit_bytes=32 * 1024 * 1024,
        ),
    )(x_packed, w1_bd, b1_t, w2_bd, b2_t, w3_bd, b3)

    # (pb_pad, pack) row-major == logical batch order; slice off padded tail rows.
    return jnp.reshape(out, (-1, 1))[:B]


def init_params(key, input_dim, hidden_size=64):
    """Deterministic init mimicking nn.Linear default (uniform +-1/sqrt(fan_in)).
    Weights stored as (in_features, out_features) so the kernel computes x @ W."""
    def linear_init(k, fan_in, fan_out):
        kw, kb = jax.random.split(k)
        bound = 1.0 / jnp.sqrt(jnp.float32(fan_in))
        w = jax.random.uniform(kw, (fan_in, fan_out), jnp.float32, -bound, bound)
        b = jax.random.uniform(kb, (1, fan_out), jnp.float32, -bound, bound)
        return w, b

    k1, k2, k3 = jax.random.split(key, 3)
    w1, b1 = linear_init(k1, input_dim, hidden_size)
    w2, b2 = linear_init(k2, hidden_size, hidden_size)
    w3, b3 = linear_init(k3, hidden_size, 1)
    return dict(w1=w1, b1=b1, w2=w2, b2=b2, w3=w3, b3=b3)


def _reference_bf16(x, p):
    """Mirrors the kernel's precision (bf16 matmul inputs, f32 accumulation)."""
    h1 = jnp.dot(x.astype(jnp.bfloat16), p["w1"].astype(jnp.bfloat16),
                 preferred_element_type=jnp.float32) + p["b1"]
    h1 = jnp.maximum(h1, 0.0)
    h2 = jnp.dot(h1.astype(jnp.bfloat16), p["w2"].astype(jnp.bfloat16),
                 preferred_element_type=jnp.float32) + p["b2"]
    h2 = jnp.maximum(h2, 0.0)
    return jnp.dot(h2.astype(jnp.bfloat16), p["w3"].astype(jnp.bfloat16),
                   preferred_element_type=jnp.float32) + p["b3"]


def _reference_f32(x, p):
    h1 = jnp.maximum(x @ p["w1"] + p["b1"], 0.0)
    h2 = jnp.maximum(h1 @ p["w2"] + p["b2"], 0.0)
    return h2 @ p["w3"] + p["b3"]


if __name__ == "__main__":
    key = jax.random.PRNGKey(0)
    k1, k2, k3, k4 = jax.random.split(key, 4)

    # Small shapes consistent with ContinuousQ(input_dim=32, hidden_size=64).
    D, H = 32, 64
    params = init_params(k1, D, H)

    # Case 1: small batch; pack=4 -> 16 packed rows -> 2 grid steps (megacore path).
    x1 = jax.random.normal(k2, (64, D), jnp.float32)
    o1 = jax.block_until_ready(continuous_q_forward(x1, params))
    assert o1.shape == (64, 1), o1.shape
    assert jnp.allclose(o1, _reference_bf16(x1, params), atol=1e-3, rtol=1e-3), \
        "mismatch vs bf16 reference"
    assert jnp.allclose(o1, _reference_f32(x1, params), atol=1e-1), \
        "mismatch vs f32 reference (loose)"

    # Case 2: ragged batch (tail padding + multi-tile grid).
    x2 = jax.random.normal(k3, (300, D), jnp.float32)
    o2 = jax.block_until_ready(continuous_q_forward(x2, params))
    assert o2.shape == (300, 1), o2.shape
    assert jnp.allclose(o2, _reference_bf16(x2, params), atol=1e-3, rtol=1e-3), \
        "mismatch vs bf16 reference (ragged)"

    # Case 3: input_dim not a power of two (exercises lane padding, D=20 -> Dp=32).
    D3 = 20
    params3 = init_params(k4, D3, H)
    x3 = jax.random.normal(k2, (40, D3), jnp.float32)
    o3 = jax.block_until_ready(continuous_q_forward(x3, params3))
    assert o3.shape == (40, 1), o3.shape
    assert jnp.allclose(o3, _reference_bf16(x3, params3), atol=1e-3, rtol=1e-3), \
        "mismatch vs bf16 reference (padded D)"

    print("KERNEL_OK")
</pallas_src>

<mosaic_0001>
module attributes {stable_mosaic.version = 11 : i64} {
  func.func @_mlp_kernel(%arg0: i32, %arg1: memref<8x128xf32, #tpu.memory_space<vmem>>, %arg2: memref<128x256xbf16, #tpu.memory_space<vmem>>, %arg3: memref<1x256xf32, #tpu.memory_space<vmem>>, %arg4: memref<256x256xbf16, #tpu.memory_space<vmem>>, %arg5: memref<1x256xf32, #tpu.memory_space<vmem>>, %arg6: memref<256x4xbf16, #tpu.memory_space<vmem>>, %arg7: memref<1x1xf32, #tpu.memory_space<smem>>, %arg8: memref<8x4xf32, #tpu.memory_space<vmem>>) attributes {dimension_semantics = [#tpu.dimension_semantics<parallel>], iteration_bounds = array<i64: 2>, scalar_prefetch = 0 : i64, scratch_operands = 0 : i64, tpu.core_type = #tpu.core_type<tc>, window_params = [{transform_indices = @transform_0, window_bounds = array<i64: 8, 128>}, {pipeline_mode = #tpu.pipeline_mode<synchronous>, transform_indices = @transform_1, window_bounds = array<i64: 128, 256>}, {pipeline_mode = #tpu.pipeline_mode<synchronous>, transform_indices = @transform_2, window_bounds = array<i64: 1, 256>}, {pipeline_mode = #tpu.pipeline_mode<synchronous>, transform_indices = @transform_3, window_bounds = array<i64: 256, 256>}, {pipeline_mode = #tpu.pipeline_mode<synchronous>, transform_indices = @transform_4, window_bounds = array<i64: 1, 256>}, {pipeline_mode = #tpu.pipeline_mode<synchronous>, transform_indices = @transform_5, window_bounds = array<i64: 256, 4>}, {transform_indices = @transform_6, window_bounds = array<i64: 1, 1>}, {transform_indices = @transform_7, window_bounds = array<i64: 8, 4>}]} {
    %c0 = arith.constant 0 : index
    %c0_0 = arith.constant 0 : index
    %0 = vector.load %arg1[%c0, %c0_0] : memref<8x128xf32, #tpu.memory_space<vmem>>, vector<8x128xf32>
    %1 = arith.truncf %0 : vector<8x128xf32> to vector<8x128xbf16>
    %c0_1 = arith.constant 0 : index
    %c0_2 = arith.constant 0 : index
    %2 = vector.load %arg2[%c0_1, %c0_2] : memref<128x256xbf16, #tpu.memory_space<vmem>>, vector<128x256xbf16>
    %cst = arith.constant dense<0.000000e+00> : vector<8x256xf32>
    %3 = tpu.matmul %1, %2, %cst {dimension_numbers = #tpu.dot_dimension_numbers<[1], [0], [0], [1], [0, 0, 1, 1], [], []>} : vector<8x128xbf16>, vector<128x256xbf16>, vector<8x256xf32> -> vector<8x256xf32>
    %c0_3 = arith.constant 0 : index
    %c0_4 = arith.constant 0 : index
    %4 = vector.load %arg3[%c0_3, %c0_4] : memref<1x256xf32, #tpu.memory_space<vmem>>, vector<1x256xf32>
    %5 = vector.broadcast %4 : vector<1x256xf32> to vector<8x256xf32>
    %6 = arith.addf %3, %5 : vector<8x256xf32>
    %cst_5 = arith.constant 0.000000e+00 : f32
    %7 = vector.broadcast %cst_5 : f32 to vector<8x256xf32>
    %8 = arith.maximumf %6, %7 : vector<8x256xf32>
    %9 = arith.truncf %8 : vector<8x256xf32> to vector<8x256xbf16>
    %c0_6 = arith.constant 0 : index
    %c0_7 = arith.constant 0 : index
    %10 = vector.load %arg4[%c0_6, %c0_7] : memref<256x256xbf16, #tpu.memory_space<vmem>>, vector<256x256xbf16>
    %cst_8 = arith.constant dense<0.000000e+00> : vector<8x256xf32>
    %11 = tpu.matmul %9, %10, %cst_8 {dimension_numbers = #tpu.dot_dimension_numbers<[1], [0], [0], [1], [0, 0, 1, 1], [], []>} : vector<8x256xbf16>, vector<256x256xbf16>, vector<8x256xf32> -> vector<8x256xf32>
    %c0_9 = arith.constant 0 : index
    %c0_10 = arith.constant 0 : index
    %12 = vector.load %arg5[%c0_9, %c0_10] : memref<1x256xf32, #tpu.memory_space<vmem>>, vector<1x256xf32>
    %13 = vector.broadcast %12 : vector<1x256xf32> to vector<8x256xf32>
    %14 = arith.addf %11, %13 : vector<8x256xf32>
    %cst_11 = arith.constant 0.000000e+00 : f32
    %15 = vector.broadcast %cst_11 : f32 to vector<8x256xf32>
    %16 = arith.maximumf %14, %15 : vector<8x256xf32>
    %17 = arith.truncf %16 : vector<8x256xf32> to vector<8x256xbf16>
    %c0_12 = arith.constant 0 : index
    %c0_13 = arith.constant 0 : index
    %18 = vector.load %arg6[%c0_12, %c0_13] : memref<256x4xbf16, #tpu.memory_space<vmem>>, vector<256x4xbf16>
    %cst_14 = arith.constant dense<0.000000e+00> : vector<8x4xf32>
    %19 = tpu.matmul %17, %18, %cst_14 {dimension_numbers = #tpu.dot_dimension_numbers<[1], [0], [0], [1], [0, 0, 1, 1], [], []>} : vector<8x256xbf16>, vector<256x4xbf16>, vector<8x4xf32> -> vector<8x4xf32>
    %c0_15 = arith.constant 0 : index
    %c0_16 = arith.constant 0 : index
    %20 = memref.load %arg7[%c0_15, %c0_16] : memref<1x1xf32, #tpu.memory_space<smem>>
    %21 = vector.broadcast %20 : f32 to vector<8x4xf32>
    %22 = arith.addf %19, %21 : vector<8x4xf32>
    %c0_17 = arith.constant 0 : index
    %c0_18 = arith.constant 0 : index
    %23 = vector.load %arg8[%c0_17, %c0_18] : memref<8x4xf32, #tpu.memory_space<vmem>>, vector<8x4xf32>
    tpu.vector_store %arg8[%c0_17, %c0_18], %22 {strides = array<i32>} : memref<8x4xf32, #tpu.memory_space<vmem>>, vector<8x4xf32>,
    return
  }
  func.func @transform_0(%arg0: i32) -> (i32, i32) {
    %c0_i32 = arith.constant 0 : i32
    %c0_i32_0 = arith.constant 0 : i32
    return %arg0, %c0_i32 : i32, i32
  }
  func.func @transform_1(%arg0: i32) -> (i32, i32) {
    %c0_i32 = arith.constant 0 : i32
    %c0_i32_0 = arith.constant 0 : i32
    %c0_i32_1 = arith.constant 0 : i32
    return %c0_i32, %c0_i32_0 : i32, i32
  }
  func.func @transform_2(%arg0: i32) -> (i32, i32) {
    %c0_i32 = arith.constant 0 : i32
    %c0_i32_0 = arith.constant 0 : i32
    %c0_i32_1 = arith.constant 0 : i32
    return %c0_i32, %c0_i32_0 : i32, i32
  }
  func.func @transform_3(%arg0: i32) -> (i32, i32) {
    %c0_i32 = arith.constant 0 : i32
    %c0_i32_0 = arith.constant 0 : i32
    %c0_i32_1 = arith.constant 0 : i32
    return %c0_i32, %c0_i32_0 : i32, i32
  }
  func.func @transform_4(%arg0: i32) -> (i32, i32) {
    %c0_i32 = arith.constant 0 : i32
    %c0_i32_0 = arith.constant 0 : i32
    %c0_i32_1 = arith.constant 0 : i32
    return %c0_i32, %c0_i32_0 : i32, i32
  }
  func.func @transform_5(%arg0: i32) -> (i32, i32) {
    %c0_i32 = arith.constant 0 : i32
    %c0_i32_0 = arith.constant 0 : i32
    %c0_i32_1 = arith.constant 0 : i32
    return %c0_i32, %c0_i32_0 : i32, i32
  }
  func.func @transform_6(%arg0: i32) -> (i32, i32) {
    %c0_i32 = arith.constant 0 : i32
    %c0_i32_0 = arith.constant 0 : i32
    %c0_i32_1 = arith.constant 0 : i32
    return %c0_i32, %c0_i32_0 : i32, i32
  }
  func.func @transform_7(%arg0: i32) -> (i32, i32) {
    %c0_i32 = arith.constant 0 : i32
    %c0_i32_0 = arith.constant 0 : i32
    return %arg0, %c0_i32 : i32, i32
  }
}

</mosaic_0001>

<bundles_post_ra>
// kernel: tpu_custom_call.1
= control target key start
LH: loop header
LB: loop body
LE: loop exit
PB: predicated region body
PF: predicated region fallthrough
CT: control target
= control target key end

     0   :  { %s1723_s0 = inlined_call_operand.hbm [shape: f32[16,128], index: 0, kind: input, shape index: {}]   ;;  %s1724_s1 = inlined_call_operand.vmem [shape: bf16[128,256], index: 1, kind: input, shape index: {}]   ;;  %s1725_s2 = inlined_call_operand.vmem [shape: f32[1,256], index: 2, kind: input, shape index: {}]   ;;  %s1726_s3 = inlined_call_operand.hbm [shape: bf16[256,256], index: 3, kind: input, shape index: {}]   ;;  %s1727_s4 = inlined_call_operand.vmem [shape: f32[1,256], index: 4, kind: input, shape index: {}]   ;;  %s1728_s5 = inlined_call_operand.vmem [shape: bf16[256,4], index: 5, kind: input, shape index: {}]   ;;  %s1729_s6 = inlined_call_operand.<no memory space> [shape: f32[1,1], index: 6, kind: input, shape index: {}]   ;;  %s1730_s7 = inlined_call_operand.vmem [shape: f32[16,4], index: 7, kind: output, shape index: {}]  }
   0x1   :  { %12 = sst [smem:[#allocation2]] %s1729_s6 }
   0x2   :  { %13 = vsyncpa [#allocation4], 0 }
   0x3   :  { %15 = vsyncpa [#allocation4 + $0x1], 0 }
   0x4   :  { %16 = vsyncpa [#allocation6], 0  ;;  %s1465_s26 = smov 0   ;;  %s1467_s27 = smov 0  }
   0x5   :  { %s1469_s28 = smov 0   ;;  %s1471_s29 = smov 0  }
   0x6 LB: > { %s222_s8 = sshll.u32 %s1726_s3, 4  ;;  %s1487_s9 = sadd.s32 4294967295, %s1417_s29   ;;  %s1417_s29 = sphi %s1471_s29, %s1737_s29   ;;  %s1413_s28 = sphi %s1469_s28, %s1736_s28   ;;  %s1409_s27 = sphi %s1467_s27, %s1735_s27   ;;  %s1405_s26 = sphi %s1465_s26, %s1734_s26   ;;  %s223_s8 = int_to_ptr.hbm [resolvable:$true] %s222_s8 }
   0x7   : > { %p936_p0 = scmp.ge.s32.totalorder %s1417_s29, 1  ;;  %p43_p1 = scmp.eq.s32.totalorder %s1487_s9, 0 }
   0x8   : > { %p205_p2 = scmp.lt.s32.totalorder %s1417_s29, 3  ;;  %s1419_s11 = smov [#allocation5]  }
   0x9   : > { %s224_s12 = sshll.u32 %s1419_s11, 4  ;;  %s1420_s13 = smov 128   ;;  %s225_s12 = int_to_ptr.vmem [resolvable:$true] %s224_s12 }
   0xa   : > { %p1492_p3 = pnand %p936_p0, %p205_p2  ;;  %s1421_s14 = smov 8  }
   0xb   : > { %s1501_s15 = sadd.s32 1, %s1417_s29   ;;  %s29_s17 = sadd.s32 1, %s1413_s28 }
   0xc   : > { %p1273_p4 = pneg %p1492_p3  ;;  %s26_s16 = ssub.s32 %s1417_s29, %s1501_s15 }
   0xd   : > { %p27_p6 = scmp.eq.s32.totalorder %s26_s16, 0  ;;  %p36_p7 = scmp.ne.s32.totalorder %s1413_s28, %s1409_s27 }
   0xe   : > { %p1274_p5 = pnand %p1273_p4, %p43_p1  ;;  %p37_p8 = scmp.eq.s32.totalorder %s1417_s29, 0 }
   0xf   : > { %p42_p9 = scmp.ne.s32.totalorder %s1409_s27, %s1405_s26  ;;  %p1282_p12 = scmp.lt.s32.totalorder %s1417_s29, 2 }
  0x10   : > { %1276 = dma.hbm_to_vmem [thread:$0]  (!%p1274_p5), %s223_s8, 4096, %s225_s12, [#allocation6], %s1420_s13, %s1420_s13, %s1421_s14  }
  0x11   : > { %s1511_s18 = scalar_select %p27_p6, %s1413_s28, %s29_s17  }
  0x12   : > { %p38_p10 = por %p37_p8, %p36_p7  ;;  %p1515_p11 = por %p43_p1, %p42_p9 }
  0x13   : > { %s247_s20 = sand.u32 1, %s1413_s28   ;;  %s940_s22 = sshll.u32 %s1417_s29, 3 }
  0x14   : > { %s939_s21 = sshll.u32 %s247_s20, 3  ;;  %s255_s25 = scalar_lea.hbm %s1723_s0, %s940_s22 }
  0x15   : > { %s251_s6 = scalar_lea.vmem [#allocation3], %s939_s21  ;;  %s257_s8 = sshll.u32 %s255_s25, 4  ;;  %s258_s8 = int_to_ptr.hbm [resolvable:$true] %s257_s8 }
  0x16   : > { %s259_s30 = sshll.u32 %s251_s6, 4  ;;  %p1525_p13 = pnand %p1282_p12, %p38_p10  ;;  %s260_s30 = int_to_ptr.vmem [resolvable:$true] %s259_s30 }
  0x17   : > { %s248_s11 = scalar_lea.sflag [#allocation4], %s247_s20  ;;  %s1349_s12 = sshra.s32 %s258_s8, 4  ;;  %s1350_s12 = int_to_ptr.hbm [resolvable:$true] %s1349_s12 }
  0x18   : > { %s1351_s13 = scalar_lea.hbm %s1350_s12, 8  ;;  %p1353_p2 = pneg %p1525_p13 }
  0x19   : > { %p1352_p0 = scmp.ne.s32.totalorder %s1350_s12, %s1351_s13  ;;  %s1356_s16 = scalar_lea.hbm %s1723_s0, 16 }
  0x1a   : > { %p1357_p6 = scmp.lt.s32.totalorder %s1350_s12, %s1723_s0  ;;  %p1358_p7 = scmp.lt.s32.totalorder %s1356_s16, %s1351_s13 }
  0x1b   : > { %p1354_p4 = pnand %p1353_p2, %p1352_p0 }
  0x1c   : > { %p1359_p8 = por %p1358_p7, %p1357_p6 }
  0x1d   : > { %p1355_p5 = pneg %p1354_p4 }
  0x1f   : > { %p1360_p9 = pnand %p1359_p8, %p1355_p5 }
  0x21   : > { %1363 = shalt.err (!%p1360_p9)
}
  0x22   : > { %1280 = dma.hbm_to_vmem [thread:$0]  (!%p1525_p13), %s258_s8, 128, %s260_s30, %s248_s11  }
  0x23   : > { %268 = sbr.rel (%p1492_p3) target bundleno = 489 (0x1e9), region = 48  ;;  %s270_s20 = sand.u32 (!%p1492_p3), 1, %s1409_s27  }
  0x24   : > { %s1542_s22 = sshll.u32 (!%p1492_p3), %s270_s20, 3  ;;  %s271_s23 = scalar_lea.sflag (!%p1492_p3), [#allocation4], %s270_s20 }
  0x25   : > { %s274_s24 = scalar_lea.vmem (!%p1492_p3), [#allocation3], %s1542_s22 }
  0x28   : > { %1396 = dma.done.wait (%p1515_p11), %s271_s23, 128  }
  0x29   : > { %1398 = vsyncadd (%p1515_p11), %s271_s23, 4294967168 }
  0x2a   : > { %1400 = dma.done.wait (%p43_p1), [#allocation6], 4096  }
  0x2b   : > { %1402 = vsyncadd (%p43_p1), [#allocation6], 4294963200  ;;  %v1003_v0 = vld [vmem:[%s1724_s1 + $0x70] sm:$0xf]  ;;  %v1218_v1 = vld [vmem:[%s1724_s1 + $0x74] sm:$0xf0] }
  0x2c   : > { %v1217_v2 = vld [vmem:[%s1724_s1 + $0x74] sm:$0xf]  ;;  %v1004_v3 = vor.u32 %v1218_v1, %v1003_v0  ;;  %v1005_v4 = vld [vmem:[%s1724_s1 + $0x78] sm:$0xf0]  ;;  %v995_v5 = vld [vmem:[%s1724_s1 + $0x60] sm:$0xf] }
  0x2d   : > { %v1216_v6 = vld [vmem:[%s1724_s1 + $0x64] sm:$0xf0]  ;;  %v1008_v7 = vor.u32 %v1217_v2, %v1005_v4  ;;  %v1215_v8 = vld [vmem:[%s1724_s1 + $0x64] sm:$0xf]  ;;  %v997_v9 = vld [vmem:[%s1724_s1 + $0x68] sm:$0xf0] }
  0x2e   : > { %418 = vmatpush.bf16.msra.mxu0 %v1004_v3  ;;  %v996_v10 = vor.u32 %v1216_v6, %v995_v5  ;;  %v1000_v11 = vor.u32 %v1215_v8, %v997_v9  ;;  %v987_v12 = vld [vmem:[%s1724_s1 + $0x50] sm:$0xf]  ;;  %v1214_v13 = vld [vmem:[%s1724_s1 + $0x54] sm:$0xf0]  ;;  %v1213_v14 = vld [vmem:[%s1724_s1 + $0x54] sm:$0xf] }
  0x2f   : > { %431 = vmatpush.bf16.msra.mxu1 %v1008_v7  ;;  %v989_v15 = vld [vmem:[%s1724_s1 + $0x58] sm:$0xf0]  ;;  %v988_v16 = vor.u32 %v1214_v13, %v987_v12  ;;  %v979_v18 = vld [vmem:[%s1724_s1 + $0x40] sm:$0xf]  ;;  %v1212_v19 = vld [vmem:[%s1724_s1 + $0x44] sm:$0xf0] }
  0x30   : > { %v992_v17 = vor.u32 %v1213_v14, %v989_v15  ;;  %v1211_v20 = vld [vmem:[%s1724_s1 + $0x44] sm:$0xf]  ;;  %v981_v21 = vld [vmem:[%s1724_s1 + $0x48] sm:$0xf0]  ;;  %v980_v22 = vor.u32 %v1212_v19, %v979_v18  ;;  %v1067_v23 = vld [vmem:[#allocation5 + $0x70] sm:$0xf] }
  0x31   : > { %v1234_v24 = vld [vmem:[#allocation5 + $0x74] sm:$0xf0]  ;;  %v1131_v25 = vld [vmem:[#allocation5 + $0xf0] sm:$0xf]  ;;  %v984_v26 = vor.u32 %v1211_v20, %v981_v21  ;;  %v971_v27 = vld [vmem:[%s1724_s1 + $0x30] sm:$0xf] }
  0x32   : > { %419 = vmatpush.bf16.msra.mxu0 %v996_v10  ;;  %v1210_v28 = vld [vmem:[%s1724_s1 + $0x34] sm:$0xf0]  ;;  %v1068_v29 = vor.u32 %v1234_v24, %v1067_v23  ;;  %v1250_v30 = vld [vmem:[#allocation5 + $0xf4] sm:$0xf0]  ;;  %v1209_v31 = vld [vmem:[%s1724_s1 + $0x34] sm:$0xf] }
  0x33   : > { %432 = vmatpush.bf16.msra.mxu1 %v1000_v11  ;;  %v973_v32 = vld [vmem:[%s1724_s1 + $0x38] sm:$0xf0]  ;;  %v1132_v33 = vor.u32 %v1250_v30, %v1131_v25  ;;  %v1059_v34 = vld [vmem:[#allocation5 + $0x60] sm:$0xf]  ;;  %v1232_v35 = vld [vmem:[#allocation5 + $0x64] sm:$0xf0]  ;;  %v972_v38 = vor.u32 %v1210_v28, %v971_v27 }
  0x34   : > { %646 = vmatpush.bf16.msra.mxu2 %v1068_v29  ;;  %v1123_v36 = vld [vmem:[#allocation5 + $0xe0] sm:$0xf]  ;;  %v1248_v37 = vld [vmem:[#allocation5 + $0xe4] sm:$0xf0]  ;;  %v963_v39 = vld [vmem:[%s1724_s1 + $0x20] sm:$0xf]  ;;  %v1060_v41 = vor.u32 %v1232_v35, %v1059_v34  ;;  %v976_v43 = vor.u32 %v1209_v31, %v973_v32 }
  0x35   : > { %v1208_v40 = vld [vmem:[%s1724_s1 + $0x24] sm:$0xf0]  ;;  %659 = vmatpush.bf16.msra.mxu3 %v1132_v33  ;;  %v1124_v42 = vor.u32 %v1248_v37, %v1123_v36  ;;  %v1207_v44 = vld [vmem:[%s1724_s1 + $0x24] sm:$0xf]  ;;  %v1051_v45 = vld [vmem:[#allocation5 + $0x50] sm:$0xf] }
  0x36   : > { %420 = vmatpush.bf16.msra.mxu0 %v988_v16  ;;  %v1230_v46 = vld [vmem:[#allocation5 + $0x54] sm:$0xf0]  ;;  %v965_v47 = vld [vmem:[%s1724_s1 + $0x28] sm:$0xf0]  ;;  %v1115_v48 = vld [vmem:[#allocation5 + $0xd0] sm:$0xf]  ;;  %v964_v51 = vor.u32 %v1208_v40, %v963_v39 }
  0x37   : > { %433 = vmatpush.bf16.msra.mxu1 %v992_v17  ;;  %v1246_v49 = vld [vmem:[#allocation5 + $0xd4] sm:$0xf0]  ;;  %v1052_v50 = vor.u32 %v1230_v46, %v1051_v45  ;;  %v955_v52 = vld [vmem:[%s1724_s1 + $0x10] sm:$0xf]  ;;  %v1228_v55 = vld [vmem:[#allocation5 + $0x44] sm:$0xf0]  ;;  %v968_v56 = vor.u32 %v1207_v44, %v965_v47 }
  0x38   : > { %647 = vmatpush.bf16.msra.mxu2 %v1060_v41  ;;  %v1116_v53 = vor.u32 %v1246_v49, %v1115_v48  ;;  %v1043_v54 = vld [vmem:[#allocation5 + $0x40] sm:$0xf]  ;;  %v1206_v57 = vld [vmem:[%s1724_s1 + $0x14] sm:$0xf0]  ;;  %v1205_v60 = vld [vmem:[%s1724_s1 + $0x14] sm:$0xf] }
  0x39   : > { %660 = vmatpush.bf16.msra.mxu3 %v1124_v42  ;;  %v1107_v58 = vld [vmem:[#allocation5 + $0xc0] sm:$0xf]  ;;  %v1244_v59 = vld [vmem:[#allocation5 + $0xc4] sm:$0xf0]  ;;  %v957_v61 = vld [vmem:[%s1724_s1 + $0x18] sm:$0xf0]  ;;  %v1044_v63 = vor.u32 %v1228_v55, %v1043_v54  ;;  %v956_v0 = vor.u32 %v1206_v57, %v955_v52 }
  0x3a   : > { %421 = vmatpush.bf16.msra.mxu0 %v980_v22  ;;  %v947_v62 = vld [vmem:[%s1724_s1] sm:$0xf]  ;;  %v1204_v1 = vld [vmem:[%s1724_s1 + $0x4] sm:$0xf0]  ;;  %v1108_v2 = vor.u32 %v1244_v59, %v1107_v58  ;;  %v960_v5 = vor.u32 %v1205_v60, %v957_v61  ;;  %v1203_v6 = vld [vmem:[%s1724_s1 + $0x4] sm:$0xf] }
  0x3b   : > { %434 = vmatpush.bf16.msra.mxu1 %v984_v26  ;;  %v1035_v3 = vld [vmem:[#allocation5 + $0x30] sm:$0xf]  ;;  %v1226_v4 = vld [vmem:[#allocation5 + $0x34] sm:$0xf0]  ;;  %v949_v9 = vld [vmem:[%s1724_s1 + $0x8] sm:$0xf0]  ;;  %v948_v15 = vor.u32 %v1204_v1, %v947_v62 }
  0x3c   : > { %648 = vmatpush.bf16.msra.mxu2 %v1052_v50  ;;  %v1099_v7 = vld [vmem:[#allocation5 + $0xb0] sm:$0xf]  ;;  %v1242_v8 = vld [vmem:[#allocation5 + $0xb4] sm:$0xf0]  ;;  %v1233_v10 = vld [vmem:[#allocation5 + $0x74] sm:$0xf]  ;;  %v1036_v14 = vor.u32 %v1226_v4, %v1035_v3  ;;  %v952_v20 = vor.u32 %v1203_v6, %v949_v9 }
  0x3d   : > { %661 = vmatpush.bf16.msra.mxu3 %v1116_v53  ;;  %v1069_v11 = vld [vmem:[#allocation5 + $0x78] sm:$0xf0]  ;;  %v1249_v12 = vld [vmem:[#allocation5 + $0xf4] sm:$0xf]  ;;  %v1100_v17 = vor.u32 %v1242_v8, %v1099_v7  ;;  %v1027_v18 = vld [vmem:[#allocation5 + $0x20] sm:$0xf] }
  0x3e   : > { %422 = vmatpush.bf16.msra.mxu0 %v972_v38  ;;  %v1133_v13 = vld [vmem:[#allocation5 + $0xf8] sm:$0xf0]  ;;  %v1224_v19 = vld [vmem:[#allocation5 + $0x24] sm:$0xf0]  ;;  %v1072_v21 = vor.u32 %v1233_v10, %v1069_v11  ;;  %v1091_v22 = vld [vmem:[#allocation5 + $0xa0] sm:$0xf] }
  0x3f   : > { %435 = vmatpush.bf16.msra.mxu1 %v976_v43  ;;  %v314_v16 = vld [vmem:[%s274_s24] sm:$0xff]  ;;  %v1240_v23 = vld [vmem:[#allocation5 + $0xa4] sm:$0xf0]  ;;  %v1136_v24 = vor.u32 %v1249_v12, %v1133_v13  ;;  %v1231_v25 = vld [vmem:[#allocation5 + $0x64] sm:$0xf]  ;;  %v1028_v30 = vor.u32 %v1224_v19, %v1027_v18  ;;  %s734_s14 = sld [smem:[#allocation2]] }
  0x40   : > { %649 = vmatpush.bf16.msra.mxu2 %v1044_v63  ;;  %v1061_v26 = vld [vmem:[#allocation5 + $0x68] sm:$0xf0]  ;;  %v315_v27 = vpack.c.bf16 %v314_v16, %v314_v16  ;;  %v1247_v28 = vld [vmem:[#allocation5 + $0xe4] sm:$0xf]  ;;  %v1092_v31 = vor.u32 %v1240_v23, %v1091_v22  ;;  %v1229_v34 = vld [vmem:[#allocation5 + $0x54] sm:$0xf] }
  0x41   : > { %662 = vmatpush.bf16.msra.mxu3 %v1108_v2  ;;  %v1125_v29 = vld [vmem:[#allocation5 + $0xe8] sm:$0xf0]  ;;  %v1064_v32 = vor.u32 %v1231_v25, %v1061_v26  ;;  %v1053_v35 = vld [vmem:[#allocation5 + $0x58] sm:$0xf0]  ;;  %v1245_v36 = vld [vmem:[#allocation5 + $0xd4] sm:$0xf] }
  0x42   : > { %423 = vmatpush.bf16.msra.mxu0 %v964_v51  ;;  %v1128_v33 = vor.u32 %v1247_v28, %v1125_v29  ;;  %v1117_v37 = vld [vmem:[#allocation5 + $0xd8] sm:$0xf0]  ;;  %v1056_v38 = vor.u32 %v1229_v34, %v1053_v35  ;;  %v1227_v40 = vld [vmem:[#allocation5 + $0x44] sm:$0xf]  ;;  %v1045_v41 = vld [vmem:[#allocation5 + $0x48] sm:$0xf0] }
  0x43   : > { %436 = vmatpush.bf16.msra.mxu1 %v968_v56  ;;  %v1120_v39 = vor.u32 %v1245_v36, %v1117_v37  ;;  %v1243_v42 = vld [vmem:[#allocation5 + $0xc4] sm:$0xf]  ;;  %v1109_v43 = vld [vmem:[#allocation5 + $0xc8] sm:$0xf0]  ;;  %v1048_v44 = vor.u32 %v1227_v40, %v1045_v41  ;;  %v1225_v46 = vld [vmem:[#allocation5 + $0x34] sm:$0xf] }
  0x44   : > { %650 = vmatpush.bf16.msra.mxu2 %v1036_v14  ;;  %v1112_v45 = vor.u32 %v1243_v42, %v1109_v43  ;;  %v1037_v47 = vld [vmem:[#allocation5 + $0x38] sm:$0xf0]  ;;  %v1241_v48 = vld [vmem:[#allocation5 + $0xb4] sm:$0xf]  ;;  %v1223_v52 = vld [vmem:[#allocation5 + $0x24] sm:$0xf] }
  0x45   : > { %663 = vmatpush.bf16.msra.mxu3 %v1100_v17  ;;  %v1101_v49 = vld [vmem:[#allocation5 + $0xb8] sm:$0xf0]  ;;  %v1040_v50 = vor.u32 %v1225_v46, %v1037_v47  ;;  %v1029_v53 = vld [vmem:[#allocation5 + $0x28] sm:$0xf0]  ;;  %v1239_v54 = vld [vmem:[#allocation5 + $0xa4] sm:$0xf] }
  0x46   : > { %424 = vmatpush.bf16.msra.mxu0 %v956_v0  ;;  %v1104_v51 = vor.u32 %v1241_v48, %v1101_v49  ;;  %v1093_v55 = vld [vmem:[#allocation5 + $0xa8] sm:$0xf0]  ;;  %v1032_v56 = vor.u32 %v1223_v52, %v1029_v53  ;;  %v1019_v58 = vld [vmem:[#allocation5 + $0x10] sm:$0xf]  ;;  %v1222_v59 = vld [vmem:[#allocation5 + $0x14] sm:$0xf0] }
  0x47   : > { %437 = vmatpush.bf16.msra.mxu1 %v960_v5  ;;  %v1096_v57 = vor.u32 %v1239_v54, %v1093_v55  ;;  %v1083_v60 = vld [vmem:[#allocation5 + $0x90] sm:$0xf]  ;;  %v1020_v61 = vor.u32 %v1222_v59, %v1019_v58  ;;  %v1238_v62 = vld [vmem:[#allocation5 + $0x94] sm:$0xf0]  ;;  %v1221_v63 = vld [vmem:[#allocation5 + $0x14] sm:$0xf] }
  0x48   : > { %651 = vmatpush.bf16.msra.mxu2 %v1028_v30  ;;  %v1021_v0 = vld [vmem:[#allocation5 + $0x18] sm:$0xf0]  ;;  %v1084_v1 = vor.u32 %v1238_v62, %v1083_v60  ;;  %v1237_v3 = vld [vmem:[#allocation5 + $0x94] sm:$0xf]  ;;  %v1011_v6 = vld [vmem:[#allocation5] sm:$0xf] }
  0x49   : > { %664 = vmatpush.bf16.msra.mxu3 %v1092_v31  ;;  %v1024_v2 = vor.u32 %v1221_v63, %v1021_v0  ;;  %v1085_v4 = vld [vmem:[#allocation5 + $0x98] sm:$0xf0]  ;;  %v1220_v7 = vld [vmem:[#allocation5 + $0x4] sm:$0xf0]  ;;  %v1075_v8 = vld [vmem:[#allocation5 + $0x80] sm:$0xf] }
  0x4a   : > { %425 = vmatpush.bf16.msra.mxu0 %v948_v15  ;;  %v1088_v5 = vor.u32 %v1237_v3, %v1085_v4  ;;  %v1012_v9 = vor.u32 %v1220_v7, %v1011_v6  ;;  %v1236_v10 = vld [vmem:[#allocation5 + $0x84] sm:$0xf0]  ;;  %v1219_v11 = vld [vmem:[#allocation5 + $0x4] sm:$0xf]  ;;  %v1013_v12 = vld [vmem:[#allocation5 + $0x8] sm:$0xf0]  ;;  %v735_v3 = vstv %s734_s14 }
  0x4b   : > { %438 = vmatpush.bf16.msra.mxu1 %v952_v20  ;;  %v1076_v13 = vor.u32 %v1236_v10, %v1075_v8  ;;  %v1016_v14 = vor.u32 %v1219_v11, %v1013_v12  ;;  %v1235_v15 = vld [vmem:[#allocation5 + $0x84] sm:$0xf]  ;;  %v1077_v16 = vld [vmem:[#allocation5 + $0x88] sm:$0xf0]  ;;  %v1264_v22 = vld [vmem:[%s1728_s5 + $0x68] sm:$0xff]  ;;  %p310_p1 = scmp.lt.s32.totalorder %s1487_s9, 1 }
  0x4c   : > { %652 = vmatpush.bf16.msra.mxu2 %v1020_v61  ;;  %v1080_v17 = vor.u32 %v1235_v15, %v1077_v16  ;;  %v1266_v18 = vld [vmem:[%s1728_s5 + $0x78] sm:$0xff]  ;;  %v1265_v20 = vld [vmem:[%s1728_s5 + $0x70] sm:$0xff]  ;;  %v1256_v23 = vld [vmem:[%s1728_s5 + $0x28] sm:$0xff]  ;;  %vm858_vm0 = vcmask 31744  }
  0x4d   : > { %426 = vmatmul.bf16.vlgmr.msra.gmra.mxu0 %v315_v27  ;;  %665 = vmatpush.bf16.msra.mxu3 %v1084_v1  ;;  %v1258_v19 = vld [vmem:[%s1728_s5 + $0x38] sm:$0xff]  ;;  %v1255_v25 = vld [vmem:[%s1728_s5 + $0x20] sm:$0xff]  ;;  %v1261_v28 = vld [vmem:[%s1728_s5 + $0x50] sm:$0xff]  ;;  %s1739_s9 = smov (!%p310_p1, %s1487_s9), 1 }
  0x4e   : > { %672 = vmatpush.bf16.msrb.mxu0 %v1072_v21  ;;  %439 = vmatmul.bf16.vlgmr.msra.gmra.mxu1 %v315_v27  ;;  %v1257_v21 = vld [vmem:[%s1728_s5 + $0x30] sm:$0xff]  ;;  %v1262_v26 = vld [vmem:[%s1728_s5 + $0x58] sm:$0xff]  ;;  %v332_v27 = vld [vmem:[%s1725_s2] sm:$0x3]  ;;  %s944_s16 = sshll.u32 %s1739_s9, 3 }
  0x4f   : > { %685 = vmatpush.bf16.msrb.mxu1 %v1136_v24  ;;  %v1263_v24 = vld [vmem:[%s1728_s5 + $0x60] sm:$0xff]  ;;  %v334_v29 = vperm.slane %v332_v27, 0  ;;  %v335_v30 = vperm.slane %v332_v27, 1  ;;  %v1254_v41 = vld [vmem:[%s1728_s5 + $0x18] sm:$0xff]  ;;  %v1260_v42 = vld [vmem:[%s1728_s5 + $0x48] sm:$0xff]  ;;  %s313_s17 = scalar_lea.vmem %s1730_s7, %s944_s16 }
  0x50   : > { %653 = vmatpush.bf16.msra.mxu2 %v1012_v9  ;;  %v1253_v43 = vld [vmem:[%s1728_s5 + $0x10] sm:$0xff]  ;;  %v1251_v46 = vld [vmem:[%s1728_s5] sm:$0xff] }
  0x51   : > { %666 = vmatpush.bf16.msra.mxu3 %v1076_v13  ;;  %v480_v47 = vld [vmem:[%s1727_s4] sm:$0x3] }
  0x52   : > { %673 = vmatpush.bf16.msrb.mxu0 %v1064_v32  ;;  %v483_v48 = vperm.slane %v480_v47, 1  ;;  %v482_v53 = vperm.slane %v480_v47, 0 }
  0x53   : > { %686 = vmatpush.bf16.msrb.mxu1 %v1128_v33 }
  0x54   : > { %832 = vmatpush.bf16.msrb.mxu2 %v1258_v19 }
  0x55   : > { %845 = vmatpush.bf16.msrb.mxu3 %v1266_v18 }
  0x56   : > { %674 = vmatpush.bf16.msrb.mxu0 %v1056_v38 }
  0x57   : > { %687 = vmatpush.bf16.msrb.mxu1 %v1120_v39 }
  0x58   : > { %833 = vmatpush.bf16.msrb.mxu2 %v1257_v21 }
  0x59   : > { %846 = vmatpush.bf16.msrb.mxu3 %v1265_v20 }
  0x5a   : > { %675 = vmatpush.bf16.msrb.mxu0 %v1048_v44  ;;  %v1259_v44 = vld [vmem:[%s1728_s5 + $0x40] sm:$0xff] }
  0x5b   : > { %688 = vmatpush.bf16.msrb.mxu1 %v1112_v45  ;;  %v1252_v45 = vld [vmem:[%s1728_s5 + $0x8] sm:$0xff] }
  0x5c   : > { %834 = vmatpush.bf16.msrb.mxu2 %v1256_v23 }
  0x5d   : > { %847 = vmatpush.bf16.msrb.mxu3 %v1264_v22 }
  0x5e   : > { %676 = vmatpush.bf16.msrb.mxu0 %v1040_v50 }
  0x5f   : > { %689 = vmatpush.bf16.msrb.mxu1 %v1104_v51 }
  0x60   : > { %835 = vmatpush.bf16.msrb.mxu2 %v1255_v25 }
  0x61   : > { %848 = vmatpush.bf16.msrb.mxu3 %v1263_v24 }
  0x62   : > { %677 = vmatpush.bf16.msrb.mxu0 %v1032_v56 }
  0x63   : > { %690 = vmatpush.bf16.msrb.mxu1 %v1096_v57 }
  0x64   : > { %836 = vmatpush.bf16.msrb.mxu2 %v1254_v41 }
  0x65   : > { %849 = vmatpush.bf16.msrb.mxu3 %v1262_v26 }
  0x66   : > { %678 = vmatpush.bf16.msrb.mxu0 %v1024_v2 }
  0x67   : > { %691 = vmatpush.bf16.msrb.mxu1 %v1088_v5 }
  0x68   : > { %837 = vmatpush.bf16.msrb.mxu2 %v1253_v43 }
  0x69   : > { %850 = vmatpush.bf16.msrb.mxu3 %v1261_v28 }
  0x6a   : > { %679 = vmatpush.bf16.msrb.mxu0 %v1016_v14 }
  0x6b   : > { %692 = vmatpush.bf16.msrb.mxu1 %v1080_v17 }
  0x6c   : > { %838 = vmatpush.bf16.msrb.mxu2 %v1252_v45 }
  0x6d   : > { %851 = vmatpush.bf16.msrb.mxu3 %v1260_v42 }
  0x70   : > { %839 = vmatpush.bf16.msrb.mxu2 %v1251_v46 }
  0x71   : > { %852 = vmatpush.bf16.msrb.mxu3 %v1259_v44 }
  0xca   : > { %v427_v31 = vpop.f32.mrf.mxu0 }
  0xcb   : > { %v428_v32 = vadd.f32 %v427_v31, %v334_v29  ;;  %v440_v33 = vpop.f32.mrf.mxu1 }
  0xcc   : > { %v441_v34 = vadd.f32 %v440_v33, %v335_v30 }
  0xcd   : > { %v444_v35 = vmax.f32 %v428_v32, 0.0 }
  0xce   : > { %v445_v36 = vmax.f32 %v441_v34, 0.0 }
  0xcf   : > { %v446_v37 = vpack.c.bf16 %v444_v35, %v444_v35 }
  0xd0   : > { %v447_v38 = vpack.c.bf16 %v445_v36, %v445_v36 }
  0xd1   : > { %654 = vmatmul.bf16.vlgmr.msra.gmra.mxu2 %v446_v37  ;;  %680 = vmatmul.bf16.vlgmr.msrb.gmra.mxu0 %v446_v37 }
  0xd2   : > { %667 = vmatmul.bf16.vlgmr.msra.gmra.mxu3 %v447_v38  ;;  %693 = vmatmul.bf16.vlgmr.msrb.gmra.mxu1 %v447_v38  ;;  %v429_v39 = vpop.f32.mrf.mxu0 }
  0xd3   : > { %v442_v40 = vpop.f32.mrf.mxu1 }
 0x14e   : > { %v681_v49 = vpop.f32.mrf.mxu0 }
 0x14f   : > { %v682_v50 = vadd.f32 %v681_v49, %v483_v48  ;;  %v694_v51 = vpop.f32.mrf.mxu1 }
 0x151   : > { %v695_v52 = vadd.f32 %v694_v51, %v682_v50 }
 0x153   : > { %v699_v54 = vmax.f32 %v695_v52, 0.0 }
 0x154   : > { %v655_v55 = vpop.f32.mrf.mxu2 }
 0x155   : > { %v701_v56 = vpack.c.bf16 %v699_v54, %v699_v54  ;;  %v656_v57 = vadd.f32 %v655_v55, %v482_v53  ;;  %v668_v58 = vpop.f32.mrf.mxu3 }
 0x156   : > { %v683_v59 = vpop.f32.mrf.mxu0 }
 0x157   : > { %v669_v60 = vadd.f32 %v668_v58, %v656_v57  ;;  %v696_v61 = vpop.f32.mrf.mxu1  ;;  %853 = vmatmul.bf16.vlgmr.msrb.gmra.mxu3 %v701_v56 }
 0x159   : > { %v698_v62 = vmax.f32 %v669_v60, 0.0 }
 0x15b   : > { %v700_v63 = vpack.c.bf16 %v698_v62, %v698_v62 }
 0x15c   : > { %v657_v0 = vpop.f32.mrf.mxu2 }
 0x15d   : > { %v670_v1 = vpop.f32.mrf.mxu3  ;;  %840 = vmatmul.bf16.vlgmr.msrb.gmra.mxu2 %v700_v63 }
 0x1da   : > { %v854_v2 = vpop.f32.mrf.mxu3 }
 0x1e0   : > { %v841_v4 = vpop.f32.mrf.mxu2 }
 0x1e1   : > { %v842_v5 = vadd.f32 %v841_v4, %v735_v3 }
 0x1e2   : > { %v856_v6 = vpop.f32.mrf.mxu3 }
 0x1e3   : > { %v855_v7 = vadd.f32 %v854_v2, %v842_v5 }
 0x1e5   : > { %859 = vst.msk [vmem:[%s313_s17] sm:$0xff] %vm858_vm0, %v855_v7 }
 0x1e8   : > { %v843_v8 = vpop.f32.mrf.mxu2 }
 0x1e9 PF: > { %p19_p3 = scmp.ge.s32.totalorder %s1501_s15, 4   ;;  %s1734_s26 = smov %s1409_s27 }
 0x1ea   : > { %s1735_s27 = smov %s1413_s28  ;;  %s1736_s28 = smov %s1511_s18 }
 0x1eb   : > { %s1737_s29 = smov %s1501_s15  ;;  %21 = sbr.rel (!%p19_p3) target bundleno = 6 (0x6), region = 92 }
 0x1f0   :  { %879 = vsyncpa [#allocation4], 1 }
 0x1f1   :  { %881 = vsyncpa [#allocation4 + $0x1], 1 }
 0x1f2   :  { %882 = vsyncpa [#allocation6], 1 }

</bundles_post_ra>
